<compile_context>
chip_gen: v7x
topology: tpu7x:2x2x1
jax: 0.10.0
libtpu: 0.0.40
codegen_flags: <defaults>
</compile_context>

<pallas_src>
import math

import jax
import jax.numpy as jnp
from jax import lax
from jax.experimental import pallas as pl
from jax.experimental.pallas import tpu as pltpu

LN_EPS = 1e-5                      # torch.nn.LayerNorm default
_INV_SQRT2 = 1.0 / math.sqrt(2.0)


def _ffn_kernel(x_ref, gamma_ref, beta_ref, w1_ref, b1_ref, w2t_ref, b2_ref,
                o_ref, xn_ref, acc_ref):
    """One (row-tile i, I-chunk k) grid step.

    x_ref:   (tm, H)   token tile (block index constant along k -> resident across k)
    w1_ref:  (tI, H)   fc1 weight chunk, compute_dtype, PyTorch [out, in] layout
    w2t_ref: (tI, H)   fc2 weight chunk, compute_dtype, pre-transposed to [I, H]
    xn_ref:  (tm, H)   compute_dtype scratch holding the LayerNorm output (set at k==0)
    acc_ref: (tm, H)   f32 accumulator for the fc2 partial sums
    """
    k = pl.program_id(1)
    nk = pl.num_programs(1)

    @pl.when(k == 0)
    def _init():
        x = x_ref[...].astype(jnp.float32)
        # LayerNorm over the last dim (biased variance, like torch), stats in f32.
        mean = jnp.mean(x, axis=-1, keepdims=True)
        centered = x - mean
        var = jnp.mean(centered * centered, axis=-1, keepdims=True)
        xn = centered * lax.rsqrt(var + LN_EPS)
        xn = xn * gamma_ref[...].astype(jnp.float32) + beta_ref[...].astype(jnp.float32)
        xn_ref[...] = xn.astype(xn_ref.dtype)     # cached in compute_dtype (MXU operand)
        acc_ref[...] = jnp.zeros_like(acc_ref)

    # --- fc1 chunk: (tm, H) . (tI, H)^T -> (tm, tI) on the MXU (bf16 operands, f32 acc) ---
    h = lax.dot_general(xn_ref[...], w1_ref[...],
                        dimension_numbers=(((1,), (1,)), ((), ())),
                        preferred_element_type=jnp.float32)
    h = h + b1_ref[...].astype(jnp.float32)

    # --- exact GELU (F.gelu default uses erf) ---
    h = 0.5 * h * (1.0 + lax.erf(h * _INV_SQRT2))

    # --- fc2 partial: (tm, tI) . (tI, H) -> (tm, H), accumulate in f32.
    #     Padded I columns (ragged I) contribute exactly zero: b1 pad = 0 -> GELU(0) = 0,
    #     and the corresponding w2t rows are zero-padded in the wrapper.
    acc_ref[...] += lax.dot_general(h.astype(w2t_ref.dtype), w2t_ref[...],
                                    dimension_numbers=(((1,), (0,)), ((), ())),
                                    preferred_element_type=jnp.float32)

    @pl.when(k == nk - 1)
    def _finalize():
        # dropout in eval mode is the identity; residual add in f32.
        y = acc_ref[...] + b2_ref[...].astype(jnp.float32)
        o_ref[...] = (x_ref[...].astype(jnp.float32) + y).astype(o_ref.dtype)


def feed_forward(hidden_states, gamma, beta, w1, b1, w2, b2, *,
                 block_m=None, block_i=None, compute_dtype=jnp.bfloat16):
    """hidden_states: [B, S, H]; w1: [I, H]; w2: [H, I] (PyTorch nn.Linear layout)."""
    B, S, H = hidden_states.shape
    I = w1.shape[0]
    M = B * S

    in_dtype = hidden_states.dtype
    bpe = jnp.dtype(in_dtype).itemsize
    cbpe = jnp.dtype(compute_dtype).itemsize

    # --- per-generation VMEM-aware tile defaults --------------------------------------
    try:
        vmem_cap = int(pltpu.get_tpu_info().vmem_capacity_bytes)
    except Exception:
        vmem_cap = 64 * 1024 * 1024                    # conservative (v7x per-TC)
    small_vmem = vmem_cap < (100 << 20)                # v7x: 64 MiB; v5e/v6e: 128 MiB
    if block_i is None:
        block_i = 256 if small_vmem else 512
    if block_m is None:
        # tm == bf16-flops per weight byte; need ~310 (v7x) / ~650 (v6e) / ~240 (v5e)
        # to reach the MXU roofline with bf16 weights.
        block_m = 384 if small_vmem else 768

    # Row tile: 16-aligned (bf16 sublane packing), prefer 128/256 to feed the MXU fully.
    row_align = 16 if min(bpe, cbpe) == 2 else 8
    tm = min(block_m, M)
    for align in (256, 128, row_align):
        if tm >= align:
            tm -= tm % align
            break
    tm = max(tm, 1)

    # Intermediate chunk: 128-lane aligned unless I itself is smaller.
    tI = min(block_i, I)
    if tI >= 128:
        tI -= tI % 128
    tI = max(tI, 1)

    n_m = pl.cdiv(M, tm)
    n_i = pl.cdiv(I, tI)
    I_pad = n_i * tI

    # --- parameter prep (one-time, outside the kernel) --------------------------------
    x2 = hidden_states.reshape(M, H)
    gr = gamma.reshape(1, H).astype(jnp.float32)
    br = beta.reshape(1, H).astype(jnp.float32)
    b2r = b2.reshape(1, H).astype(jnp.float32)

    w1c = w1.astype(compute_dtype)                     # [I, H]  (contiguous row slabs)
    w2t = jnp.transpose(w2).astype(compute_dtype)      # [I, H]  (contiguous row slabs)
    b1r = b1.reshape(1, I).astype(jnp.float32)

    if I_pad != I:                                     # ragged I -> zero-pad once
        pad = I_pad - I
        w1c = jnp.pad(w1c, ((0, pad), (0, 0)))
        w2t = jnp.pad(w2t, ((0, pad), (0, 0)))
        b1r = jnp.pad(b1r, ((0, 0), (0, pad)))

    # --- VMEM budget: double-buffered tiles + persistent scratch, 1.5x headroom,
    #     capped at 0.8x of the physical per-core VMEM. ---------------------------------
    vmem_est = (2 * (tm * H * bpe                      # x tile
                     + 2 * tI * H * cbpe               # w1 + w2t chunks (bf16)
                     + tI * 4 + 3 * H * 4              # b1 chunk, b2, gamma, beta
                     + tm * H * bpe)                   # out tile
                + tm * H * cbpe                        # xn scratch (compute_dtype)
                + tm * H * 4)                          # f32 accumulator
    vmem_limit = int(min(max(int(1.5 * vmem_est), 32 * 1024 * 1024),
                         int(0.8 * vmem_cap)))

    cost = pl.CostEstimate(
        flops=4 * M * H * I,                           # two matmuls, 2*M*H*I each
        transcendentals=M * I,                         # erf per fc1 activation
        bytes_accessed=(2 * M * H * bpe                # x read + out write
                        + n_m * 2 * H * I_pad * cbpe   # weights re-streamed per row tile
                        + n_m * (I_pad + 3 * H) * 4),  # biases + LN params per row tile
    )

    out = pl.pallas_call(
        _ffn_kernel,
        out_shape=jax.ShapeDtypeStruct((M, H), in_dtype),
        grid_spec=pltpu.PrefetchScalarGridSpec(
            num_scalar_prefetch=0,
            grid=(n_m, n_i),                                   # rows parallel, I reduction last
            in_specs=[
                pl.BlockSpec((tm, H), lambda i, k: (i, 0)),    # x tile (resident across k)
                pl.BlockSpec((1, H), lambda i, k: (0, 0)),     # layernorm gamma
                pl.BlockSpec((1, H), lambda i, k: (0, 0)),     # layernorm beta
                pl.BlockSpec((tI, H), lambda i, k: (k, 0)),    # fc1 weight chunk [I_pad, H]
                pl.BlockSpec((1, tI), lambda i, k: (0, k)),    # fc1 bias chunk
                pl.BlockSpec((tI, H), lambda i, k: (k, 0)),    # fc2 weight^T chunk [I_pad, H]
                pl.BlockSpec((1, H), lambda i, k: (0, 0)),     # fc2 bias
            ],
            out_specs=pl.BlockSpec((tm, H), lambda i, k: (i, 0)),
            scratch_shapes=[
                pltpu.VMEM((tm, H), compute_dtype),            # LayerNorm output cache
                pltpu.VMEM((tm, H), jnp.float32),              # fc2 accumulator
            ],
        ),
        compiler_params=pltpu.CompilerParams(
            dimension_semantics=("parallel", "arbitrary"),
            vmem_limit_bytes=vmem_limit,
        ),
        cost_estimate=cost,
    )(x2, gr, br, w1c, b1r, w2t, b2r)

    return out.reshape(B, S, H)


def reference_f32(x, gamma, beta, w1, b1, w2, b2):
    """Pure-JAX f32 reference mirroring the PyTorch forward (eval mode, no fast weights)."""
    xf = x.astype(jnp.float32)
    mean = jnp.mean(xf, axis=-1, keepdims=True)
    var = jnp.mean((xf - mean) ** 2, axis=-1, keepdims=True)
    xn = (xf - mean) / jnp.sqrt(var + LN_EPS) * gamma + beta
    h = xn @ w1.T + b1
    h = 0.5 * h * (1.0 + lax.erf(h * _INV_SQRT2))
    y = h @ w2.T + b2
    return xf + y


def reference_mixed(x, gamma, beta, w1, b1, w2, b2, compute_dtype=jnp.bfloat16):
    """Reference with the same bf16-operand / f32-accumulate matmul policy as the kernel."""
    xf = x.astype(jnp.float32)
    mean = jnp.mean(xf, axis=-1, keepdims=True)
    var = jnp.mean((xf - mean) ** 2, axis=-1, keepdims=True)
    xn = (xf - mean) * lax.rsqrt(var + LN_EPS) * gamma + beta
    h = lax.dot_general(xn.astype(compute_dtype), w1.astype(compute_dtype),
                        dimension_numbers=(((2,), (1,)), ((), ())),
                        preferred_element_type=jnp.float32) + b1
    h = 0.5 * h * (1.0 + lax.erf(h * _INV_SQRT2))
    y = lax.dot_general(h.astype(compute_dtype), w2.astype(compute_dtype),
                        dimension_numbers=(((2,), (1,)), ((), ())),
                        preferred_element_type=jnp.float32) + b2
    return xf + y


if __name__ == "__main__":
    # Small shapes consistent with the module: [batch=2, seq=16, hidden=32].
    B, S, H = 2, 16, 32

    key = jax.random.PRNGKey(0)
    kx, kw1, kw2 = jax.random.split(key, 3)
    x = jax.random.normal(kx, (B, S, H), dtype=jnp.float32)
    gamma = jnp.ones((H,), dtype=jnp.float32)
    beta = jnp.zeros((H,), dtype=jnp.float32)

    # Three configs: default I=4H (2 row tiles), a 2-chunk reduction, and a ragged I
    # (exercises the wrapper-side zero-padding path).
    configs = [
        (H * 4, dict(block_m=16, block_i=128)),   # grid (2, 1)
        (H * 8, dict(block_m=16, block_i=128)),   # grid (2, 2): I reduction axis
        (160,   dict(block_m=16, block_i=128)),   # I=160 -> padded to 256, grid (2, 2)
    ]

    for I, tiles in configs:
        # Deterministic parameter init mirroring _init_weights():
        # fc1/fc2 weights ~ N(0, 0.02), biases zero; LayerNorm gamma=1, beta=0.
        w1 = 0.02 * jax.random.normal(kw1, (I, H), dtype=jnp.float32)   # fc1.weight [I, H]
        b1 = jnp.zeros((I,), dtype=jnp.float32)
        w2 = 0.02 * jax.random.normal(kw2, (H, I), dtype=jnp.float32)   # fc2.weight [H, I]
        b2 = jnp.zeros((H,), dtype=jnp.float32)

        out = feed_forward(x, gamma, beta, w1, b1, w2, b2, **tiles)
        out = jax.block_until_ready(out)

        ref_mix = reference_mixed(x, gamma, beta, w1, b1, w2, b2)
        ref_f32 = reference_f32(x, gamma, beta, w1, b1, w2, b2)

        assert out.shape == (B, S, H)
        # Tight check vs. a reference using the same bf16-operand matmul policy.
        assert jnp.allclose(out, ref_mix, atol=1e-3, rtol=1e-3), \
            (I, float(jnp.max(jnp.abs(out - ref_mix))))
        # Looser check vs. the full-f32 torch-equivalent reference (bf16 MXU operands).
        assert jnp.allclose(out, ref_f32, atol=5e-3, rtol=5e-3), \
            (I, float(jnp.max(jnp.abs(out - ref_f32))))

    # Also exercise the auto-tiling path (tile defaults chosen from VMEM capacity).
    I = H * 4
    w1 = 0.02 * jax.random.normal(kw1, (I, H), dtype=jnp.float32)
    w2 = 0.02 * jax.random.normal(kw2, (H, I), dtype=jnp.float32)
    b1 = jnp.zeros((I,), dtype=jnp.float32)
    b2 = jnp.zeros((H,), dtype=jnp.float32)
    out = jax.block_until_ready(feed_forward(x, gamma, beta, w1, b1, w2, b2))
    assert jnp.allclose(out, reference_mixed(x, gamma, beta, w1, b1, w2, b2),
                        atol=1e-3, rtol=1e-3)

    print("KERNEL_OK")
</pallas_src>

<mosaic_0001>
module attributes {stable_mosaic.version = 11 : i64} {
  func.func @_ffn_kernel(%arg0: i32, %arg1: i32, %arg2: memref<16x32xf32, #tpu.memory_space<vmem>>, %arg3: memref<1x32xf32, #tpu.memory_space<vmem>>, %arg4: memref<1x32xf32, #tpu.memory_space<vmem>>, %arg5: memref<128x32xbf16, #tpu.memory_space<vmem>>, %arg6: memref<1x128xf32, #tpu.memory_space<vmem>>, %arg7: memref<128x32xbf16, #tpu.memory_space<vmem>>, %arg8: memref<1x32xf32, #tpu.memory_space<vmem>>, %arg9: memref<16x32xf32, #tpu.memory_space<vmem>>, %arg10: memref<16x32xbf16, #tpu.memory_space<vmem>>, %arg11: memref<16x32xf32, #tpu.memory_space<vmem>>) attributes {dimension_semantics = [#tpu.dimension_semantics<parallel>, #tpu.dimension_semantics<arbitrary>], iteration_bounds = array<i64: 2, 1>, scalar_prefetch = 0 : i64, scratch_operands = 2 : i64, tpu.core_type = #tpu.core_type<tc>, window_params = [{transform_indices = @transform_0, window_bounds = array<i64: 16, 32>}, {pipeline_mode = #tpu.pipeline_mode<synchronous>, transform_indices = @transform_1, window_bounds = array<i64: 1, 32>}, {pipeline_mode = #tpu.pipeline_mode<synchronous>, transform_indices = @transform_2, window_bounds = array<i64: 1, 32>}, {transform_indices = @transform_3, window_bounds = array<i64: 128, 32>}, {transform_indices = @transform_4, window_bounds = array<i64: 1, 128>}, {transform_indices = @transform_5, window_bounds = array<i64: 128, 32>}, {pipeline_mode = #tpu.pipeline_mode<synchronous>, transform_indices = @transform_6, window_bounds = array<i64: 1, 32>}, {transform_indices = @transform_7, window_bounds = array<i64: 16, 32>}]} {
    %c0_i32 = arith.constant 0 : i32
    %0 = arith.cmpi eq, %arg1, %c0_i32 : i32
    %1 = arith.extui %0 : i1 to i32
    %c0_i32_0 = arith.constant 0 : i32
    %2 = arith.cmpi ne, %1, %c0_i32_0 : i32
    scf.if %2 {
      %c0_18 = arith.constant 0 : index
      %c0_19 = arith.constant 0 : index
      %26 = vector.load %arg2[%c0_18, %c0_19] : memref<16x32xf32, #tpu.memory_space<vmem>>, vector<16x32xf32>
      %cst_20 = arith.constant dense<0.000000e+00> : vector<16xf32>
      %27 = vector.multi_reduction <add>, %26, %cst_20 [1] : vector<16x32xf32> to vector<16xf32>
      %28 = vector.shape_cast %27 : vector<16xf32> to vector<16x1xf32>
      %cst_21 = arith.constant 3.200000e+01 : f32
      %29 = vector.broadcast %cst_21 : f32 to vector<16x1xf32>
      %30 = arith.divf %28, %29 : vector<16x1xf32>
      %31 = vector.broadcast %30 : vector<16x1xf32> to vector<16x32xf32>
      %32 = arith.subf %26, %31 : vector<16x32xf32>
      %33 = arith.mulf %32, %32 : vector<16x32xf32>
      %cst_22 = arith.constant dense<0.000000e+00> : vector<16xf32>
      %34 = vector.multi_reduction <add>, %33, %cst_22 [1] : vector<16x32xf32> to vector<16xf32>
      %35 = vector.shape_cast %34 : vector<16xf32> to vector<16x1xf32>
      %cst_23 = arith.constant 3.200000e+01 : f32
      %36 = vector.broadcast %cst_23 : f32 to vector<16x1xf32>
      %37 = arith.divf %35, %36 : vector<16x1xf32>
      %cst_24 = arith.constant 9.99999974E-6 : f32
      %38 = vector.broadcast %cst_24 : f32 to vector<16x1xf32>
      %39 = arith.addf %37, %38 : vector<16x1xf32>
      %40 = math.rsqrt %39 : vector<16x1xf32>
      %41 = vector.broadcast %40 : vector<16x1xf32> to vector<16x32xf32>
      %42 = arith.mulf %32, %41 : vector<16x32xf32>
      %c0_25 = arith.constant 0 : index
      %c0_26 = arith.constant 0 : index
      %43 = vector.load %arg3[%c0_25, %c0_26] : memref<1x32xf32, #tpu.memory_space<vmem>>, vector<1x32xf32>
      %44 = vector.broadcast %43 : vector<1x32xf32> to vector<16x32xf32>
      %45 = arith.mulf %42, %44 : vector<16x32xf32>
      %c0_27 = arith.constant 0 : index
      %c0_28 = arith.constant 0 : index
      %46 = vector.load %arg4[%c0_27, %c0_28] : memref<1x32xf32, #tpu.memory_space<vmem>>, vector<1x32xf32>
      %47 = vector.broadcast %46 : vector<1x32xf32> to vector<16x32xf32>
      %48 = arith.addf %45, %47 : vector<16x32xf32>
      %49 = arith.truncf %48 : vector<16x32xf32> to vector<16x32xbf16>
      %c0_29 = arith.constant 0 : index
      %c0_30 = arith.constant 0 : index
      %50 = vector.load %arg10[%c0_29, %c0_30] : memref<16x32xbf16, #tpu.memory_space<vmem>>, vector<16x32xbf16>
      tpu.vector_store %arg10[%c0_29, %c0_30], %49 {strides = array<i32>} : memref<16x32xbf16, #tpu.memory_space<vmem>>, vector<16x32xbf16>,
      %cst_31 = arith.constant 0.000000e+00 : f32
      %51 = vector.broadcast %cst_31 : f32 to vector<16x32xf32>
      %c0_32 = arith.constant 0 : index
      %c0_33 = arith.constant 0 : index
      %52 = vector.load %arg11[%c0_32, %c0_33] : memref<16x32xf32, #tpu.memory_space<vmem>>, vector<16x32xf32>
      tpu.vector_store %arg11[%c0_32, %c0_33], %51 {strides = array<i32>} : memref<16x32xf32, #tpu.memory_space<vmem>>, vector<16x32xf32>,
    } else {
    }
    %c0 = arith.constant 0 : index
    %c0_1 = arith.constant 0 : index
    %3 = vector.load %arg10[%c0, %c0_1] : memref<16x32xbf16, #tpu.memory_space<vmem>>, vector<16x32xbf16>
    %c0_2 = arith.constant 0 : index
    %c0_3 = arith.constant 0 : index
    %4 = vector.load %arg5[%c0_2, %c0_3] : memref<128x32xbf16, #tpu.memory_space<vmem>>, vector<128x32xbf16>
    %cst = arith.constant dense<0.000000e+00> : vector<16x128xf32>
    %5 = tpu.matmul %3, %4, %cst {dimension_numbers = #tpu.dot_dimension_numbers<[1], [1], [0], [0], [0, 0, 1, 0], [], []>} : vector<16x32xbf16>, vector<128x32xbf16>, vector<16x128xf32> -> vector<16x128xf32>
    %c0_4 = arith.constant 0 : index
    %c0_5 = arith.constant 0 : index
    %6 = vector.load %arg6[%c0_4, %c0_5] : memref<1x128xf32, #tpu.memory_space<vmem>>, vector<1x128xf32>
    %7 = vector.broadcast %6 : vector<1x128xf32> to vector<16x128xf32>
    %8 = arith.addf %5, %7 : vector<16x128xf32>
    %cst_6 = arith.constant 5.000000e-01 : f32
    %9 = vector.broadcast %cst_6 : f32 to vector<16x128xf32>
    %10 = arith.mulf %9, %8 : vector<16x128xf32>
    %cst_7 = arith.constant 0.707106769 : f32
    %11 = vector.broadcast %cst_7 : f32 to vector<16x128xf32>
    %12 = arith.mulf %8, %11 : vector<16x128xf32>
    %13 = math.erf %12 : vector<16x128xf32>
    %cst_8 = arith.constant 1.000000e+00 : f32
    %14 = vector.broadcast %cst_8 : f32 to vector<16x128xf32>
    %15 = arith.addf %14, %13 : vector<16x128xf32>
    %16 = arith.mulf %10, %15 : vector<16x128xf32>
    %c0_9 = arith.constant 0 : index
    %c0_10 = arith.constant 0 : index
    %17 = vector.load %arg11[%c0_9, %c0_10] : memref<16x32xf32, #tpu.memory_space<vmem>>, vector<16x32xf32>
    %18 = arith.truncf %16 : vector<16x128xf32> to vector<16x128xbf16>
    %c0_11 = arith.constant 0 : index
    %c0_12 = arith.constant 0 : index
    %19 = vector.load %arg7[%c0_11, %c0_12] : memref<128x32xbf16, #tpu.memory_space<vmem>>, vector<128x32xbf16>
    %cst_13 = arith.constant dense<0.000000e+00> : vector<16x32xf32>
    %20 = tpu.matmul %18, %19, %cst_13 {dimension_numbers = #tpu.dot_dimension_numbers<[1], [0], [0], [1], [0, 0, 1, 1], [], []>} : vector<16x128xbf16>, vector<128x32xbf16>, vector<16x32xf32> -> vector<16x32xf32>
    %21 = arith.addf %17, %20 : vector<16x32xf32>
    %c0_14 = arith.constant 0 : index
    %c0_15 = arith.constant 0 : index
    %22 = vector.load %arg11[%c0_14, %c0_15] : memref<16x32xf32, #tpu.memory_space<vmem>>, vector<16x32xf32>
    tpu.vector_store %arg11[%c0_14, %c0_15], %21 {strides = array<i32>} : memref<16x32xf32, #tpu.memory_space<vmem>>, vector<16x32xf32>,
    %c0_i32_16 = arith.constant 0 : i32
    %23 = arith.cmpi eq, %arg1, %c0_i32_16 : i32
    %24 = arith.extui %23 : i1 to i32
    %c0_i32_17 = arith.constant 0 : i32
    %25 = arith.cmpi ne, %24, %c0_i32_17 : i32
    scf.if %25 {
      %c0_18 = arith.constant 0 : index
      %c0_19 = arith.constant 0 : index
      %26 = vector.load %arg11[%c0_18, %c0_19] : memref<16x32xf32, #tpu.memory_space<vmem>>, vector<16x32xf32>
      %c0_20 = arith.constant 0 : index
      %c0_21 = arith.constant 0 : index
      %27 = vector.load %arg8[%c0_20, %c0_21] : memref<1x32xf32, #tpu.memory_space<vmem>>, vector<1x32xf32>
      %28 = vector.broadcast %27 : vector<1x32xf32> to vector<16x32xf32>
      %29 = arith.addf %26, %28 : vector<16x32xf32>
      %c0_22 = arith.constant 0 : index
      %c0_23 = arith.constant 0 : index
      %30 = vector.load %arg2[%c0_22, %c0_23] : memref<16x32xf32, #tpu.memory_space<vmem>>, vector<16x32xf32>
      %31 = arith.addf %30, %29 : vector<16x32xf32>
      %c0_24 = arith.constant 0 : index
      %c0_25 = arith.constant 0 : index
      %32 = vector.load %arg9[%c0_24, %c0_25] : memref<16x32xf32, #tpu.memory_space<vmem>>, vector<16x32xf32>
      tpu.vector_store %arg9[%c0_24, %c0_25], %31 {strides = array<i32>} : memref<16x32xf32, #tpu.memory_space<vmem>>, vector<16x32xf32>,
    } else {
    }
    return
  }
  func.func @transform_0(%arg0: i32, %arg1: i32) -> (i32, i32) {
    %c0_i32 = arith.constant 0 : i32
    %c0_i32_0 = arith.constant 0 : i32
    return %arg0, %c0_i32 : i32, i32
  }
  func.func @transform_1(%arg0: i32, %arg1: i32) -> (i32, i32) {
    %c0_i32 = arith.constant 0 : i32
    %c0_i32_0 = arith.constant 0 : i32
    %c0_i32_1 = arith.constant 0 : i32
    return %c0_i32, %c0_i32_0 : i32, i32
  }
  func.func @transform_2(%arg0: i32, %arg1: i32) -> (i32, i32) {
    %c0_i32 = arith.constant 0 : i32
    %c0_i32_0 = arith.constant 0 : i32
    %c0_i32_1 = arith.constant 0 : i32
    return %c0_i32, %c0_i32_0 : i32, i32
  }
  func.func @transform_3(%arg0: i32, %arg1: i32) -> (i32, i32) {
    %c0_i32 = arith.constant 0 : i32
    %c0_i32_0 = arith.constant 0 : i32
    return %arg1, %c0_i32 : i32, i32
  }
  func.func @transform_4(%arg0: i32, %arg1: i32) -> (i32, i32) {
    %c0_i32 = arith.constant 0 : i32
    %c0_i32_0 = arith.constant 0 : i32
    return %c0_i32, %arg1 : i32, i32
  }
  func.func @transform_5(%arg0: i32, %arg1: i32) -> (i32, i32) {
    %c0_i32 = arith.constant 0 : i32
    %c0_i32_0 = arith.constant 0 : i32
    return %arg1, %c0_i32 : i32, i32
  }
  func.func @transform_6(%arg0: i32, %arg1: i32) -> (i32, i32) {
    %c0_i32 = arith.constant 0 : i32
    %c0_i32_0 = arith.constant 0 : i32
    %c0_i32_1 = arith.constant 0 : i32
    return %c0_i32, %c0_i32_0 : i32, i32
  }
  func.func @transform_7(%arg0: i32, %arg1: i32) -> (i32, i32) {
    %c0_i32 = arith.constant 0 : i32
    %c0_i32_0 = arith.constant 0 : i32
    return %arg0, %c0_i32 : i32, i32
  }
}

</mosaic_0001>

<bundles_post_ra>
// kernel: tpu_custom_call.1
= control target key start
LH: loop header
LB: loop body
LE: loop exit
PB: predicated region body
PF: predicated region fallthrough
CT: control target
= control target key end

     0   :  { %12 = vsyncpa [#allocation5], 0  ;;  %s1336_s0 = inlined_call_operand.vmem [shape: f32[32,32], index: 0, kind: input, shape index: {}]   ;;  %s1337_s1 = inlined_call_operand.vmem [shape: f32[1,32], index: 1, kind: input, shape index: {}]   ;;  %s1338_s2 = inlined_call_operand.vmem [shape: f32[1,32], index: 2, kind: input, shape index: {}]   ;;  %s1339_s3 = inlined_call_operand.vmem [shape: bf16[128,32], index: 3, kind: input, shape index: {}]   ;;  %s1340_s4 = inlined_call_operand.vmem [shape: f32[1,128], index: 4, kind: input, shape index: {}]   ;;  %s1341_s5 = inlined_call_operand.vmem [shape: bf16[128,32], index: 5, kind: input, shape index: {}]   ;;  %s1342_s6 = inlined_call_operand.vmem [shape: f32[1,32], index: 6, kind: input, shape index: {}]   ;;  %s1343_s7 = inlined_call_operand.hbm [shape: f32[32,32], index: 7, kind: output, shape index: {}]  }
   0x1   :  { %14 = vsyncpa [#allocation5 + $0x1], 0  ;;  %s1112_s24 = smov 0   ;;  %s1114_s25 = smov 0  }
   0x2   :  { %s1116_s26 = smov 0   ;;  %s1118_s27 = smov 0  }
   0x3   :  { %s1120_s28 = smov 0   ;;  %s1122_s29 = smov 0  }
   0x4 LB: > { %s808_s30 = sadd.s32 4294967295, %s1065_s29   ;;  %s809_s8 = sadd.s32 4294967294, %s1065_s29   ;;  %s1065_s29 = sphi %s1122_s29, %s20_s29   ;;  %s1061_s28 = sphi %s1120_s28, %s1350_s28   ;;  %s1057_s27 = sphi %s1118_s27, %s1349_s27   ;;  %s1053_s26 = sphi %s1116_s26, %s1348_s26   ;;  %s1049_s25 = sphi %s1114_s25, %s1347_s25   ;;  %s1045_s24 = sphi %s1112_s24, %s1346_s24  }
   0x5   : > { %s32_s9 = sadd.s32 1, %s1061_s28  ;;  %s206_s10 = sadd.s32 1, %s1053_s26 }
   0x6   : > { %p34_p0 = scmp.ge.s32.totalorder %s32_s9, 2  ;;  %p216_p1 = scmp.ne.s32.totalorder %s1053_s26, %s1049_s25 }
   0x7   : > { %p217_p2 = scmp.eq.s32.totalorder %s808_s30, 1  ;;  %p222_p3 = scmp.ne.s32.totalorder %s1049_s25, %s1045_s24 }
   0x8   : > { %s1352_s9 = smov (%p34_p0, %s32_s9), 0  ;;  %p223_p5 = scmp.eq.s32.totalorder %s809_s8, 1 }
   0x9   : > { %p1152_p4 = por %p217_p2, %p216_p1  ;;  %s203_s12 = ssub.s32 %s1061_s28, %s1352_s9 }
   0xa   : > { %p815_p6 = scmp.ge.s32.totalorder %s1065_s29, 1  ;;  %p204_p7 = scmp.eq.s32.totalorder %s203_s12, 0 }
   0xb   : > { %p1159_p8 = por %p223_p5, %p222_p3  ;;  %p283_p9 = scmp.lt.s32.totalorder %s1065_s29, 3 }
   0xc   : > { %s1165_s14 = scalar_select %p204_p7, %s1053_s26, %s206_s10  }
   0xd   : > { %p284_p10 = pnand %p815_p6, %p283_p9 }
   0xe   : > { %s817_s15 = sshll.u32 (!%p284_p10), %s1057_s27, 1  ;;  %vm357_vm0 = vcmask (!%p284_p10), 261120   ;;  %v963_v4 = vld [vmem:[%s1339_s3] sm:$0xff] (!%p284_p10)   ;;  %v1067_v5 = vmov (!%p284_p10), 0.0   ;;  %v964_v7 = vld [vmem:[%s1339_s3 + $0x8] sm:$0xff] (!%p284_p10)   ;;  %v965_v9 = vld [vmem:[%s1339_s3 + $0x10] sm:$0xff] (!%p284_p10)  }
   0xf   : > { %287 = sbr.rel (%p284_p10) target bundleno = 831 (0x33f), region = 48  ;;  %p329_p11 = scmp.lt.s32.totalorder (!%p284_p10), %s817_s15, 3  ;;  %864 = vmatprep.subr.bf16.mxu0 (!%p284_p10), %v1067_v5  ;;  %405 = vst.msk [vmem:[#allocation3] sm:$0xff] (!%p284_p10), %vm357_vm0, %v1067_v5  ;;  %406 = vst.msk [vmem:[#allocation3 + $0x8] sm:$0xff] (!%p284_p10), %vm357_vm0, %v1067_v5  ;;  %884 = vmatprep.subr.bf16.mxu1 (!%p284_p10), %v1067_v5  ;;  %v476_v6 = vsel (!%p284_p10), %vm357_vm0, %v963_v4, 0  ;;  %v479_v8 = vsel (!%p284_p10), %vm357_vm0, %v964_v7, 0 }
  0x10   : > { %865 = vmatpush3.bf16.xpose.msra.mxu0 (!%p284_p10), %v476_v6  ;;  %v482_v10 = vsel (!%p284_p10), %vm357_vm0, %v965_v9, 0  ;;  %v966_v11 = vld [vmem:[%s1339_s3 + $0x18] sm:$0xff] (!%p284_p10)   ;;  %v967_v23 = vld [vmem:[%s1339_s3 + $0x20] sm:$0xff] (!%p284_p10)   ;;  %v968_v25 = vld [vmem:[%s1339_s3 + $0x28] sm:$0xff] (!%p284_p10)   ;;  %vm1068_vm1 = vmmov (!%p284_p10), 0   ;;  %s845_s23 = sshll.u32 (!%p284_p10), %s1057_s27, 8 }
  0x11   : > { %866 = vmatprep.subr.bf16.mxu0 (!%p284_p10), %v1067_v5  ;;  %v485_v12 = vsel (!%p284_p10), %vm357_vm0, %v966_v11, 0  ;;  %v488_v24 = vsel (!%p284_p10), %vm357_vm0, %v967_v23, 0  ;;  %v491_v26 = vsel (!%p284_p10), %vm357_vm0, %v968_v25, 0  ;;  %v969_v27 = vld [vmem:[%s1339_s3 + $0x30] sm:$0xff] (!%p284_p10)   ;;  %v970_v29 = vld [vmem:[%s1339_s3 + $0x38] sm:$0xff] (!%p284_p10)   ;;  %880 = vmatprep.mubr.msk.bf16.mxu0 (!%p284_p10), %vm1068_vm1, %v1067_v5  ;;  %v971_v31 = vld [vmem:[%s1341_s5] sm:$0xff] (!%p284_p10)  }
  0x12   : > { %v494_v28 = vsel (!%p284_p10), %vm357_vm0, %v969_v27, 0  ;;  %v497_v30 = vsel (!%p284_p10), %vm357_vm0, %v970_v29, 0  ;;  %900 = vmatprep.mubr.msk.bf16.mxu1 (!%p284_p10), %vm1068_vm1, %v1067_v5  ;;  %885 = vmatpush3.bf16.msra.mxu1 (!%p284_p10), %v971_v31  ;;  %v972_v32 = vld [vmem:[%s1341_s5 + $0x8] sm:$0xff] (!%p284_p10)   ;;  %v819_v41 = vld [vmem:[%s1337_s1] ss:$0 sm:$0xff] (!%p284_p10)  ;;  %v973_v51 = vld [vmem:[%s1341_s5 + $0x10] sm:$0xff] (!%p284_p10)  }
  0x13   : > { %886 = vmatprep.subr.bf16.mxu1 (!%p284_p10), %v1067_v5  ;;  %v820_v45 = vld [vmem:[%s1338_s2] ss:$0 sm:$0xff] (!%p284_p10)  ;;  %v974_v52 = vld [vmem:[%s1341_s5 + $0x18] sm:$0xff] (!%p284_p10)   ;;  %v976_v54 = vld [vmem:[%s1341_s5 + $0x28] sm:$0xff] (!%p284_p10)   ;;  %s1069_s17 = smov (!%p284_p10), [#allocation4]  }
  0x14   : > { %v975_v53 = vld [vmem:[%s1341_s5 + $0x20] sm:$0xff] (!%p284_p10)   ;;  %v977_v55 = vld [vmem:[%s1341_s5 + $0x30] sm:$0xff] (!%p284_p10)   ;;  %v978_v56 = vld [vmem:[%s1341_s5 + $0x38] sm:$0xff] (!%p284_p10)   ;;  %s991_s18 = sshll.u32 (!%p284_p10), %s1069_s17, 4  ;;  %s992_s18 = int_to_ptr.vmem [resolvable:$false] %s991_s18 }
  0x15   : > { %v821_v57 = vld [vmem:[%s1340_s4] ss:$0 sm:$0xff] (!%p284_p10) }
  0x16   : > { %s1354_s15 = smov (!%p329_p11, %s817_s15), 3  ;;  %887 = vmatpush3.bf16.msra.mxu1 %v972_v32 }
  0x17   : > { %s818_s16 = sshll.u32 %s1354_s15, 3  ;;  %888 = vmatprep.subr.bf16.mxu1 %v1067_v5  ;;  %s1283_s15 = scalar_lea.hbm %s1343_s7, %s845_s23 }
  0x18   : > { %s332_s19 = scalar_lea.vmem %s1336_s0, %s818_s16  ;;  %867 = vmatpush3.bf16.xpose.msra.mxu0 %v479_v8 }
  0x19   : > { %v1171_v0 = vld [vmem:[%s332_s19] sm:$0xff]  ;;  %v1173_v1 = vld [vmem:[%s332_s19 + $0x8] sm:$0xff]  ;;  %868 = vmatprep.subr.bf16.mxu0 %v1067_v5  ;;  %s325_s19 = sand.u32 1, %s1049_s25  }
  0x1a   : > { %v358_v2 = vsel %vm357_vm0, %v1171_v0, 0.0  ;;  %v361_v3 = vsel %vm357_vm0, %v1173_v1, 0.0  ;;  %889 = vmatpush3.bf16.msra.mxu1 %v973_v51  ;;  %s816_s20 = sshll.u32 %s325_s19, 4  ;;  %s1290_s27 = scalar_lea.sflag [#allocation5], %s325_s19 }
  0x1b   : > { %359 = vadd.xlane.f32.xlu0 %v358_v2  ;;  %890 = vmatprep.subr.bf16.mxu1 %v1067_v5  ;;  %s327_s30 = scalar_lea.vmem [#allocation4], %s816_s20  ;;  %s993_s20 = scalar_lea.vmem %s992_s18, 512 }
  0x1c   : > { %s696_s8 = sshll.u32 %s327_s30, 4  ;;  %s1285_s8 = int_to_ptr.vmem [resolvable:$true] %s696_s8 }
  0x1d   : > { %s987_s16 = scalar_lea.vmem %s1285_s8, 256  ;;  %p994_p1 = scmp.lt.s32.totalorder %s1285_s8, %s992_s18 }
  0x1e   : > { %891 = vmatpush3.bf16.msra.mxu1 %v974_v52  ;;  %p988_p12 = scmp.ne.s32.totalorder %s1285_s8, %s987_s16  ;;  %p995_p2 = scmp.lt.s32.totalorder %s993_s20, %s987_s16 }
  0x1f   : > { %362 = vadd.xlane.f32.xlu0 %v361_v3  ;;  %892 = vmatprep.subr.bf16.mxu1 %v1067_v5 }
  0x20   : > { %869 = vmatpush3.bf16.xpose.msra.mxu0 %v482_v10  ;;  %p989_p13 = pnand %p988_p12, %p1152_p4  ;;  %p996_p3 = por %p995_p2, %p994_p1 }
  0x21   : > { %870 = vmatprep.subr.bf16.mxu0 %v1067_v5 }
  0x22   : > { %893 = vmatpush3.bf16.msra.mxu1 %v975_v53  ;;  %p990_p0 = pneg %p989_p13 }
  0x23   : > { %894 = vmatprep.subr.bf16.mxu1 %v1067_v5 }
  0x24   : > { %p997_p5 = pnand %p996_p3, %p990_p0 }
  0x26   : > { %895 = vmatpush3.bf16.msra.mxu1 %v976_v54 }
  0x27   : > { %896 = vmatprep.subr.bf16.mxu1 %v1067_v5 }
  0x28   : > { %871 = vmatpush3.bf16.xpose.msra.mxu0 %v485_v12 }
  0x29   : > { %872 = vmatprep.subr.bf16.mxu0 %v1067_v5 }
  0x2a   : > { %897 = vmatpush3.bf16.msra.mxu1 %v977_v55 }
  0x2b   : > { %898 = vmatprep.subr.bf16.mxu1 %v1067_v5 }
  0x2e   : > { %899 = vmatpush3.bf16.msra.mxu1 %v978_v56 }
  0x30   : > { %873 = vmatpush3.bf16.xpose.msra.mxu0 %v488_v24 }
  0x31   : > { %874 = vmatprep.subr.bf16.mxu0 %v1067_v5 }
  0x38   : > { %875 = vmatpush3.bf16.xpose.msra.mxu0 %v491_v26 }
  0x39   : > { %876 = vmatprep.subr.bf16.mxu0 %v1067_v5 }
  0x40   : > { %877 = vmatpush3.bf16.xpose.msra.mxu0 %v494_v28 }
  0x41   : > { %878 = vmatprep.subr.bf16.mxu0 %v1067_v5 }
  0x48   : > { %879 = vmatpush3.bf16.xpose.msra.mxu0 %v497_v30 }
  0xa8   : > { %v360_v13 = vpop.xlane.xlu0 %359 }
  0xa9   : > { %v365_v14 = vmul.f32 0.03125, %v360_v13  ;;  %v550_v13 = vld [vmem:[#allocation3] sm:$0xff] }
  0xab   : > { %v367_v15 = vsub.f32 %v1171_v0, %v365_v14 }
  0xac   : > { %v363_v16 = vpop.xlane.xlu0 %362 }
  0xad   : > { %v366_v17 = vmul.f32 0.03125, %v363_v16  ;;  %v369_v18 = vmul.f32 %v367_v15, %v367_v15 }
  0xaf   : > { %v368_v19 = vsub.f32 %v1173_v1, %v366_v17  ;;  %v371_v20 = vsel %vm357_vm0, %v369_v18, 0.0 }
  0xb0   : > { %372 = vadd.xlane.f32.xlu1 %v371_v20 }
  0xb1   : > { %v370_v21 = vmul.f32 %v368_v19, %v368_v19 }
  0xb3   : > { %v374_v22 = vsel %vm357_vm0, %v370_v21, 0.0  ;;  %v839_v21 = vld [vmem:[%s1342_s6] ss:$0 sm:$0xff] }
  0xb4   : > { %375 = vadd.xlane.f32.xlu1 %v374_v22 }
 0x13d   : > { %v373_v33 = vpop.xlane.xlu1 %372 }
 0x13e   : > { %v377_v34 = vmul.f32 0.03125, %v373_v33 }
 0x140   : > { %v379_v35 = vadd.f32 1e-05, %v377_v34 }
 0x141   : > { %v376_v36 = vpop.xlane.xlu1 %375 }
 0x142   : > { %979 = vrsqrt.f32 %v379_v35  ;;  %v378_v37 = vmul.f32 0.03125, %v376_v36 }
 0x144   : > { %v380_v38 = vadd.f32 1e-05, %v378_v37 }
 0x146   : > { %981 = vrsqrt.f32 %v380_v38 }
 0x14c   : > { %v980_v39 = vpop.eup %979 }
 0x14d   : > { %v383_v40 = vmul.f32 %v980_v39, %v367_v15  ;;  %v551_v15 = vld [vmem:[#allocation3 + $0x8] sm:$0xff] }
 0x14f   : > { %v392_v43 = vmul.f32 %v819_v41, %v383_v40 }
 0x150   : > { %v982_v42 = vpop.eup %981 }
 0x151   : > { %v384_v44 = vmul.f32 %v982_v42, %v368_v19  ;;  %v401_v47 = vadd.f32 %v820_v45, %v392_v43 }
 0x153   : > { %v393_v46 = vmul.f32 %v819_v41, %v384_v44 }
 0x155   : > { %v402_v48 = vadd.f32 %v820_v45, %v393_v46 }
 0x157   : > { %v403_v49 = vpack.c.bf16 %v402_v48, %v401_v47 }
 0x159   : > { %404 = vst.msk [vmem:[#allocation2] sm:$0xff] %vm357_vm0, %v403_v49 }
 0x160   : > { %v407_v50 = vld [vmem:[#allocation2] sm:$0xff] }
 0x161   : > { %881 = vmatmul.mubr.msk.bf16.vlgmr.msra.gmra.mrb[0].mxu0 %vm357_vm0, %v407_v50 }
 0x234   : > { %v533_v58 = vpop.f32.mrb[0].mxu0 }
 0x235   : > { %v534_v59 = vadd.f32 %v821_v57, %v533_v58  ;;  %v882_v60 = vpop.f32.mrb[1].mxu0 }
 0x236   : > { %v536_v61 = vpop.f32.mrb[2].mxu0 }
 0x237   : > { %v542_v62 = vmul.f32 0.70710677, %v534_v59  ;;  %v537_v63 = vadd.f32 %v821_v57, %v536_v61  ;;  %v883_v2 = vpop.f32.mrb[3].mxu0  ;;  %v540_v7 = vmul.f32 0.5, %v534_v59 }
 0x239   : > { %983 = verf.f32 %v542_v62  ;;  %v543_v3 = vmul.f32 0.70710677, %v537_v63  ;;  %v541_v8 = vmul.f32 0.5, %v537_v63 }
 0x23b   : > { %985 = verf.f32 %v543_v3 }
 0x243   : > { %v984_v4 = vpop.eup %983 }
 0x244   : > { %v546_v5 = vadd.f32 1.0, %v984_v4 }
 0x245   : > { %v986_v6 = vpop.eup %985 }
 0x246   : > { %v547_v9 = vadd.f32 1.0, %v986_v6  ;;  %v548_v10 = vmul.f32 %v546_v5, %v540_v7 }
 0x248   : > { %v549_v11 = vmul.f32 %v547_v9, %v541_v8 }
 0x24a   : > { %v552_v12 = vpack.c.bf16 %v549_v11, %v548_v10 }
 0x24c   : > { %901 = vmatmul.mubr.bf16.vlgmr.msra.gmra.mrb[0].mxu1 %v552_v12 }
 0x31f   : > { %v651_v14 = vpop.f32.mrb[0].mxu1 }
 0x320   : > { %v658_v16 = vadd.f32 %v651_v14, %v550_v13  ;;  %v902_v17 = vpop.f32.mrb[1].mxu1 }
 0x321   : > { %v654_v18 = vpop.f32.mrb[2].mxu1 }
 0x322   : > { %660 = vst.msk [vmem:[#allocation3] sm:$0xff] %vm357_vm0, %v658_v16  ;;  %v659_v19 = vadd.f32 %v654_v18, %v551_v15  ;;  %v903_v20 = vpop.f32.mrb[3].mxu1 }
 0x324   : > { %661 = vst.msk [vmem:[#allocation3 + $0x8] sm:$0xff] %vm357_vm0, %v659_v19 }
 0x329   : > { %v665_v22 = vld [vmem:[#allocation3] sm:$0xff] }
 0x32a   : > { %v674_v23 = vadd.f32 %v839_v21, %v665_v22 }
 0x32b   : > { %v666_v24 = vld [vmem:[#allocation3 + $0x8] sm:$0xff] }
 0x32c   : > { %v675_v25 = vadd.f32 %v839_v21, %v666_v24  ;;  %v678_v26 = vadd.f32 %v674_v23, %v1171_v0 }
 0x32e   : > { %v679_v27 = vadd.f32 %v1173_v1, %v675_v25  ;;  %680 = vst.msk [vmem:[%s327_s30] sm:$0xff] %vm357_vm0, %v678_v26 }
 0x330   : > { %681 = vst.msk [vmem:[%s327_s30 + $0x8] sm:$0xff] %vm357_vm0, %v679_v27 }
 0x331   : > { %1000 = shalt.err (!%p997_p5)
}
 0x332   : > { %s1001_s19 = scalar_lea.hbm %s1283_s15, 256  ;;  %s1005_s23 = scalar_lea.hbm %s1343_s7, 512 }
 0x333   : > { %p1002_p6 = scmp.ne.s32.totalorder %s1283_s15, %s1001_s19  ;;  %p1006_p10 = scmp.lt.u32.totalorder %s1283_s15, %s1343_s7 }
 0x334   : > { %p1007_p11 = scmp.lt.u32.totalorder %s1005_s23, %s1001_s19  ;;  %p1009_p13 = scmp.lt.u32.totalorder %s1001_s19, %s1283_s15 }
 0x335   : > { %p1003_p7 = pnand %p1002_p6, %p1152_p4 }
 0x336   : > { %p1008_p12 = por %p1007_p11, %p1006_p10 }
 0x337   : > { %p1004_p9 = pneg %p1003_p7 }
 0x338   : > { %p1010_p0 = por %p1009_p13, %p1008_p12 }
 0x33a   : > { %p1011_p1 = pnand %p1010_p0, %p1004_p9 }
 0x33c   : > { %1014 = shalt.err (!%p1011_p1)
}
 0x33d   : > { %s1070_s12 = smov 128   ;;  %s1071_s16 = smov 8  }
 0x33e   : > { %904 = dma.vmem_to_hbm [thread:$0]  (%p1152_p4), %s1285_s8, 256, %s1283_s15, %s1290_s27, %s1070_s12, %s1070_s12, %s1071_s16  }
 0x33f PF: > { %p910_p2 = scmp.ge.s32.totalorder %s1065_s29, 2  ;;  %s711_s17 = sand.u32 1, %s1045_s24  }
 0x340   : > { %s712_s18 = scalar_lea.sflag [#allocation5], %s711_s17 }
 0x341   : > { %p907_p3 = pnand %p910_p2, %p1159_p8 }
 0x343   : > { %1040 = dma.done.wait (!%p907_p3), %s712_s18, 256  }
 0x344   : > { %1042 = vsyncadd (!%p907_p3), %s712_s18, 4294967040  ;;  %s20_s29 = sadd.s32 1, %s1065_s29   ;;  %s1346_s24 = smov %s1049_s25 }
 0x345   : > { %p17_p5 = scmp.ge.s32.totalorder %s20_s29, 4   ;;  %s1347_s25 = smov %s1053_s26 }
 0x346   : > { %s1348_s26 = smov %s1165_s14  ;;  %s1349_s27 = smov %s1061_s28 }
 0x347   : > { %s1350_s28 = smov %s1352_s9  ;;  %19 = sbr.rel (!%p17_p5) target bundleno = 4 (0x4), region = 100 }
 0x34e   :  { %717 = vsyncpa [#allocation5], 1 }
 0x34f   :  { %719 = vsyncpa [#allocation5 + $0x1], 1 }

</bundles_post_ra>
